<compile_context>
chip_gen: v7x
topology: tpu7x:2x2x1
jax: 0.10.0
libtpu: 0.0.40
codegen_flags: <defaults>
</compile_context>

<pallas_src>
import functools
import math

import numpy as np
import jax
import jax.numpy as jnp
from jax import lax
from jax.experimental import pallas as pl
from jax.experimental.pallas import tpu as pltpu


def _rms(v, w, eps=1e-6):
    ms = jnp.mean(v * v, axis=-1, keepdims=True)
    return v * lax.rsqrt(ms + eps) * w


# -------------------- kernel 1: RMSNorm + K/V projection + rotary(K) --------------------

def kv_rope_kernel(x_ref, cos_ref, sin_ref, anorm_ref, wkv_ref, k_ref, v_ref,
                   *, n_heads, head_dim):
    dim = n_heads * head_dim
    dh = dim // 2
    hd2 = head_dim // 2

    x = x_ref[0]                                   # (TS, D) f32
    ts = x.shape[0]
    xn = _rms(x, anorm_ref[...]).astype(jnp.bfloat16)
    kv = jnp.dot(xn, wkv_ref[...], preferred_element_type=jnp.float32)   # (TS, 2D) f32

    cos = cos_ref[...]                             # (TS, D/2) f32, per-head tiled
    sin = sin_ref[...]

    # K columns are laid out [all-heads even | all-heads odd]; rotary = 4 wide VPU muls.
    ke = kv[:, :dh]
    ko = kv[:, dh:dim]
    vv = kv[:, dim:]
    k_even = ke * cos - ko * sin                   # (TS, D/2)
    k_odd = ke * sin + ko * cos

    k_hs = jnp.concatenate(
        [k_even.reshape(ts, n_heads, hd2), k_odd.reshape(ts, n_heads, hd2)], axis=-1)
    k_ref[0] = jnp.transpose(k_hs, (1, 0, 2)).astype(jnp.bfloat16)        # (H, TS, hd)
    v_ref[0] = jnp.transpose(vv.reshape(ts, n_heads, head_dim),
                             (1, 0, 2)).astype(jnp.bfloat16)              # (H, TS, hd)


# ---------- kernel 2: Q prologue + flash attention + out proj + residual + FFN ----------

def attn_ffn_kernel(x_ref, cos_ref, sin_ref, anorm_ref, wq_ref,
                    k_ref, v_ref, wo_ref, bo_ref, fnorm_ref,
                    w1_ref, b1_ref, w2_ref, b2_ref, onorm_ref,
                    o_ref, q_sc, m_sc, l_sc, acc_sc,
                    *, tq, tk, n_heads, head_dim, apply_out_norm):
    dim = n_heads * head_dim
    dh = dim // 2
    hd2 = head_dim // 2
    qi = pl.program_id(1)
    ki = pl.program_id(2)

    @pl.when(ki == 0)
    def _prologue():
        # RMSNorm + Q projection (softmax scale folded into wq) + rotary for this q tile.
        xn = _rms(x_ref[0], anorm_ref[...]).astype(jnp.bfloat16)
        q = jnp.dot(xn, wq_ref[...], preferred_element_type=jnp.float32)  # (TQ, D) f32
        cos = cos_ref[...]
        sin = sin_ref[...]
        qe = q[:, :dh]
        qo = q[:, dh:]
        q_even = qe * cos - qo * sin
        q_odd = qe * sin + qo * cos
        q_hs = jnp.concatenate(
            [q_even.reshape(tq, n_heads, hd2), q_odd.reshape(tq, n_heads, hd2)], axis=-1)
        q_sc[...] = jnp.transpose(q_hs, (1, 0, 2)).astype(jnp.bfloat16)   # (H, TQ, hd)
        m_sc[...] = jnp.full(m_sc.shape, -jnp.inf, jnp.float32)
        l_sc[...] = jnp.zeros(l_sc.shape, jnp.float32)
        acc_sc[...] = jnp.zeros(acc_sc.shape, jnp.float32)

    q_start = qi * tq
    k_start = ki * tk
    not_fully_masked = k_start <= q_start + tq - 1
    fully_unmasked = k_start + tk - 1 <= q_start

    def _scores():
        # one fused K=hd contraction per head, batched over heads on the MXU
        return jnp.einsum('hqd,hkd->hqk', q_sc[...], k_ref[0],
                          preferred_element_type=jnp.float32)             # (H,TQ,TK) f32

    def _online_update(s):
        m_prev = m_sc[...]
        m_new = jnp.maximum(m_prev, jnp.max(s, axis=-1, keepdims=True))
        alpha = jnp.exp(m_prev - m_new)
        p = jnp.exp(s - m_new)
        l_sc[...] = alpha * l_sc[...] + jnp.sum(p, axis=-1, keepdims=True)
        acc_sc[...] = alpha * acc_sc[...] + jnp.einsum(
            'hqk,hkd->hqd', p.astype(jnp.bfloat16), v_ref[0],
            preferred_element_type=jnp.float32)
        m_sc[...] = m_new

    # Diagonal-crossing tiles: need the causal mask.
    @pl.when(jnp.logical_and(not_fully_masked, jnp.logical_not(fully_unmasked)))
    def _diag():
        s = _scores()
        row = q_start + lax.broadcasted_iota(jnp.int32, (tq, tk), 0)
        col = k_start + lax.broadcasted_iota(jnp.int32, (tq, tk), 1)
        s = jnp.where((col <= row)[None, :, :], s, -1e30)
        _online_update(s)

    # Interior tiles: fully below the diagonal -> skip iota/compare/where entirely.
    @pl.when(fully_unmasked)
    def _interior():
        _online_update(_scores())

    @pl.when(ki == pl.num_programs(2) - 1)
    def _finalize():
        inv_l = pl.reciprocal(l_sc[...], approx=True)          # EUP slot, not VALU
        o = (acc_sc[...] * inv_l).astype(jnp.bfloat16)         # (H, TQ, hd)
        # single relayout to (TQ, D) then one consolidated K=D output projection
        o_flat = jnp.transpose(o, (1, 0, 2)).reshape(tq, dim)
        y = jnp.dot(o_flat, wo_ref[...], preferred_element_type=jnp.float32) + bo_ref[...]
        # TODO(synk): attention dropout (p=0.1) omitted — eval/deterministic semantics.
        h_res = x_ref[0] + y                                   # f32 residual stream

        hn = _rms(h_res, fnorm_ref[...]).astype(jnp.bfloat16)
        f1 = jnp.dot(hn, w1_ref[...], preferred_element_type=jnp.float32) + b1_ref[...]
        g = 0.5 * f1 * (1.0 + lax.erf(f1 * (1.0 / math.sqrt(2.0))))   # exact GELU
        f2 = jnp.dot(g.astype(jnp.bfloat16), w2_ref[...],
                     preferred_element_type=jnp.float32) + b2_ref[...]
        # TODO(synk): FFN dropout (p=0.1) omitted — eval/deterministic semantics.
        out = h_res + f2
        if apply_out_norm:            # final output RMSNorm fused into the last layer
            out = _rms(out, onorm_ref[...])
        o_ref[0] = out


# ----------------------------- per-generation tuning knobs ------------------------------

def _device_kind():
    try:
        return jax.devices()[0].device_kind.lower()
    except Exception:
        return ""


def _vmem_limit_bytes():
    kind = _device_kind()
    if ("v2" in kind) or ("v3" in kind) or ("v4" in kind) or (kind == ""):
        return None                       # keep compiler defaults on older/unknown parts
    if "7" in kind:
        return 48 * 1024 * 1024           # v7x: 64 MiB physical per TC, leave headroom
    return 100 * 1024 * 1024              # v5e / v5p / v6e: 128 MiB physical


def _compiler_params(dim_sem):
    kw = dict(dimension_semantics=dim_sem)
    lim = _vmem_limit_bytes()
    if lim is not None:
        kw["vmem_limit_bytes"] = lim
    return pltpu.CompilerParams(**kw)


def _pick_tile(T):
    kind = _device_kind()
    pref = 256 if ("v6" in kind or "7" in kind) else 128   # fill 256^2 MXU on v6e/v7x
    for cand in (pref, 128):
        if cand <= T and T % cand == 0:
            return cand
    return T                                                # toy shapes: single tile


# ------------------------------------- wrappers -----------------------------------------

def run_kv_rope(x, cos_f, sin_f, lp, n_heads, *, ts):
    B, T, D = x.shape
    hd = D // n_heads
    dh = D // 2
    kern = functools.partial(kv_rope_kernel, n_heads=n_heads, head_dim=hd)
    head_out = jax.ShapeDtypeStruct((B, n_heads, T, hd), jnp.bfloat16)
    head_spec = pl.BlockSpec((1, n_heads, ts, hd), lambda b, i: (b, 0, i, 0))
    cost = pl.CostEstimate(
        flops=int(2 * B * T * D * 2 * D + 8 * B * T * dh),
        transcendentals=int(B * T),
        bytes_accessed=int(B * T * D * 4 + D * 2 * D * 2 + 2 * B * T * D * 2
                           + 2 * T * dh * 4 + D * 4),
    )
    return pl.pallas_call(
        kern,
        out_shape=(head_out, head_out),
        grid=(B, T // ts),
        in_specs=[
            pl.BlockSpec((1, ts, D), lambda b, i: (b, i, 0)),
            pl.BlockSpec((ts, dh), lambda b, i: (i, 0)),
            pl.BlockSpec((ts, dh), lambda b, i: (i, 0)),
            pl.BlockSpec((1, D), lambda b, i: (0, 0)),
            pl.BlockSpec((D, 2 * D), lambda b, i: (0, 0)),
        ],
        out_specs=(head_spec, head_spec),
        compiler_params=_compiler_params(("parallel", "parallel")),
        cost_estimate=cost,
    )(x, cos_f, sin_f, lp["anorm"], lp["wkv_t"])


def run_attn_ffn(k, v, x, cos_f, sin_f, lp, n_heads, onorm_w, apply_out_norm, *, tq, tk):
    B, T, D = x.shape
    hd = D // n_heads
    dh = D // 2
    kern = functools.partial(attn_ffn_kernel, tq=tq, tk=tk, n_heads=n_heads,
                             head_dim=hd, apply_out_norm=apply_out_norm)

    def w_spec(shape):
        zeros = (0,) * len(shape)
        # Grid-invariant -> stays VMEM-resident across the q/kv axes.
        # TODO(synk): pipeline_mode=pl.Buffered(1) on v7x to single-buffer resident weights;
        #             tile w1/w2 over the 4D hidden axis at production D.
        return pl.BlockSpec(shape, lambda b, i, j: zeros)

    def kv_map(b, i, j):
        # Clamp fully-masked causal steps to the diagonal block: unchanged block index
        # means Pallas skips the K/V re-fetch (pl.when below skips the compute).
        return (b, 0, jnp.minimum(j, (i * tq + tq - 1) // tk), 0)

    cost = pl.CostEstimate(
        flops=int(20 * B * T * D * D + 4 * B * T * T * D),
        transcendentals=int(B * n_heads * T * T + 4 * B * T * D + 3 * B * T),
        bytes_accessed=int(2 * B * T * D * 4                       # x in + out, f32
                           + 2 * B * T * D * 2 * max(1, T // tq)   # K/V bf16 re-reads
                           + (2 * D * D + 8 * D * D) * 2           # weights, bf16
                           + 2 * T * dh * 4),
    )

    return pl.pallas_call(
        kern,
        out_shape=jax.ShapeDtypeStruct((B, T, D), jnp.float32),
        grid=(B, T // tq, T // tk),
        in_specs=[
            pl.BlockSpec((1, tq, D), lambda b, i, j: (b, i, 0)),
            pl.BlockSpec((tq, dh), lambda b, i, j: (i, 0)),
            pl.BlockSpec((tq, dh), lambda b, i, j: (i, 0)),
            w_spec((1, D)),                                   # attention_norm weight
            w_spec((D, D)),                                   # wq (rotary layout, scaled)
            pl.BlockSpec((1, n_heads, tk, hd), kv_map),       # K
            pl.BlockSpec((1, n_heads, tk, hd), kv_map),       # V
            w_spec((D, D)),                                   # wo
            w_spec((1, D)),                                   # bo
            w_spec((1, D)),                                   # ffn_norm weight
            w_spec((D, 4 * D)),                               # w1
            w_spec((1, 4 * D)),                               # b1
            w_spec((4 * D, D)),                               # w2
            w_spec((1, D)),                                   # b2
            w_spec((1, D)),                                   # output_norm weight
        ],
        out_specs=pl.BlockSpec((1, tq, D), lambda b, i, j: (b, i, 0)),
        scratch_shapes=[
            pltpu.VMEM((n_heads, tq, hd), jnp.bfloat16),      # rotated q tile
            pltpu.VMEM((n_heads, tq, 1), jnp.float32),        # running max
            pltpu.VMEM((n_heads, tq, 1), jnp.float32),        # running denom
            pltpu.VMEM((n_heads, tq, hd), jnp.float32),       # output accumulator
        ],
        compiler_params=_compiler_params(("parallel", "parallel", "arbitrary")),
        cost_estimate=cost,
    )(x, cos_f, sin_f, lp["anorm"], lp["wq_t"], k, v, lp["wo_t"], lp["bo"],
      lp["fnorm"], lp["w1_t"], lp["b1"], lp["w2_t"], lp["b2"], onorm_w)


def run_layer(x, cos_f, sin_f, lp, n_heads, out_norm_w=None):
    B, T, D = x.shape
    t = _pick_tile(T)
    assert T % t == 0
    # TODO(synk): carry the inter-layer residual stream in bf16 for further HBM savings
    #             (kept f32 here for closer parity with the f32 PyTorch reference).
    k, v = run_kv_rope(x, cos_f, sin_f, lp, n_heads, ts=t)
    apply_out_norm = out_norm_w is not None
    onorm = out_norm_w if apply_out_norm else jnp.ones((1, D), jnp.float32)
    return run_attn_ffn(k, v, x, cos_f, sin_f, lp, n_heads, onorm, apply_out_norm,
                        tq=t, tk=t)


# ---------------------------------- host-side params ------------------------------------

def precompute_cos_sin(head_dim, seq_len, n_heads, theta=10000.0):
    # matches torch precompute_freqs_cis: freqs_cis = polar(1, outer(t, freqs)); the
    # (T, hd/2) cos/sin tables are tiled across heads host-side -> lane-dense (T, D/2).
    freqs = 1.0 / (theta ** (np.arange(0, head_dim, 2)[: head_dim // 2]
                             .astype(np.float32) / head_dim))
    t = np.arange(seq_len, dtype=np.float32)
    ang = np.outer(t, freqs)                                  # (T, hd/2)
    cos = np.tile(np.cos(ang), (1, n_heads))                  # (T, D/2)
    sin = np.tile(np.sin(ang), (1, n_heads))
    return jnp.asarray(cos, jnp.float32), jnp.asarray(sin, jnp.float32)


def init_params(key, num_layers, dim, n_heads):
    hd = dim // n_heads
    scale = hd ** (-0.5)
    # column permutation: interleaved rotary pairs -> [all-heads even | all-heads odd]
    even_idx = np.concatenate([h * hd + np.arange(0, hd, 2) for h in range(n_heads)])
    odd_idx = np.concatenate([h * hd + np.arange(1, hd, 2) for h in range(n_heads)])
    rot_perm = np.concatenate([even_idx, odd_idx])            # (dim,)

    layers = []
    for _ in range(num_layers):
        key, *ks = jax.random.split(key, 8)
        wqkv = jax.random.normal(ks[0], (3 * dim, dim), jnp.float32) * 0.02  # torch (out,in)
        wo = jax.random.normal(ks[1], (dim, dim), jnp.float32) * 0.02
        bo = jax.random.normal(ks[2], (dim,), jnp.float32) * 0.02
        w1 = jax.random.normal(ks[3], (4 * dim, dim), jnp.float32) * 0.02
        b1 = jax.random.normal(ks[4], (4 * dim,), jnp.float32) * 0.02
        w2 = jax.random.normal(ks[5], (dim, 4 * dim), jnp.float32) * 0.02
        b2 = jax.random.normal(ks[6], (dim,), jnp.float32) * 0.02

        wqkv_t = wqkv.T                                       # (D, 3D): cols = out features
        wq_t = wqkv_t[:, rot_perm] * scale                    # softmax scale folded into Q
        wk_t = wqkv_t[:, dim + rot_perm]
        wv_t = wqkv_t[:, 2 * dim:]
        wkv_t = jnp.concatenate([wk_t, wv_t], axis=1)         # (D, 2D)

        layers.append(dict(
            anorm=jnp.ones((1, dim), jnp.float32),            # RMSNorm default weight = 1
            fnorm=jnp.ones((1, dim), jnp.float32),
            wq_t=wq_t.astype(jnp.bfloat16),                   # (D, D)  rotary layout, bf16
            wkv_t=wkv_t.astype(jnp.bfloat16),                 # (D, 2D) rotary layout (K), bf16
            wo_t=wo.T.astype(jnp.bfloat16),                   # (D, D)
            bo=bo.reshape(1, dim),                            # biases / norms stay f32
            w1_t=w1.T.astype(jnp.bfloat16),                   # (D, 4D)
            b1=b1.reshape(1, 4 * dim),
            w2_t=w2.T.astype(jnp.bfloat16),                   # (4D, D)
            b2=b2.reshape(1, dim),
        ))
    out_norm_w = jnp.ones((1, dim), jnp.float32)
    return layers, out_norm_w


if __name__ == "__main__":
    B, T, D, H, L = 2, 8, 32, 4, 2          # batch, seq, embed_dim, heads, layers
    key = jax.random.PRNGKey(0)
    k_x, k_p = jax.random.split(key)
    x = jax.random.normal(k_x, (B, T, D), jnp.float32)

    layers, out_norm_w = init_params(k_p, L, D, H)
    cos_f, sin_f = precompute_cos_sin(D // H, T, H)   # model uses freqs_cis[:T]

    h = x
    for li, lp in enumerate(layers):
        h = run_layer(h, cos_f, sin_f, lp, H,
                      out_norm_w=out_norm_w if li == L - 1 else None)

    jax.block_until_ready(h)
    assert h.shape == (B, T, D)
    print("KERNEL_OK")
</pallas_src>

<mosaic_0001>
module attributes {stable_mosaic.version = 11 : i64} {
  func.func @kv_rope_kernel(%arg0: i32, %arg1: i32, %arg2: memref<1x8x32xf32, #tpu.memory_space<vmem>>, %arg3: memref<8x16xf32, #tpu.memory_space<vmem>>, %arg4: memref<8x16xf32, #tpu.memory_space<vmem>>, %arg5: memref<1x32xf32, #tpu.memory_space<vmem>>, %arg6: memref<32x64xbf16, #tpu.memory_space<vmem>>, %arg7: memref<1x4x8x8xbf16, #tpu.memory_space<vmem>>, %arg8: memref<1x4x8x8xbf16, #tpu.memory_space<vmem>>) attributes {dimension_semantics = [#tpu.dimension_semantics<parallel>, #tpu.dimension_semantics<parallel>], iteration_bounds = array<i64: 2, 1>, scalar_prefetch = 0 : i64, scratch_operands = 0 : i64, tpu.core_type = #tpu.core_type<tc>, window_params = [{transform_indices = @transform_0, window_bounds = array<i64: 1, 8, 32>}, {transform_indices = @transform_1, window_bounds = array<i64: 8, 16>}, {transform_indices = @transform_2, window_bounds = array<i64: 8, 16>}, {pipeline_mode = #tpu.pipeline_mode<synchronous>, transform_indices = @transform_3, window_bounds = array<i64: 1, 32>}, {pipeline_mode = #tpu.pipeline_mode<synchronous>, transform_indices = @transform_4, window_bounds = array<i64: 32, 64>}, {transform_indices = @transform_5, window_bounds = array<i64: 1, 4, 8, 8>}, {transform_indices = @transform_6, window_bounds = array<i64: 1, 4, 8, 8>}]} {
    %c0 = arith.constant 0 : index
    %c0_0 = arith.constant 0 : index
    %c0_1 = arith.constant 0 : index
    %0 = vector.load %arg2[%c0, %c0_0, %c0_1] : memref<1x8x32xf32, #tpu.memory_space<vmem>>, vector<1x8x32xf32>
    %1 = vector.shape_cast %0 : vector<1x8x32xf32> to vector<8x32xf32>
    %c0_2 = arith.constant 0 : index
    %c0_3 = arith.constant 0 : index
    %2 = vector.load %arg5[%c0_2, %c0_3] : memref<1x32xf32, #tpu.memory_space<vmem>>, vector<1x32xf32>
    %3 = arith.mulf %1, %1 : vector<8x32xf32>
    %cst = arith.constant dense<0.000000e+00> : vector<8xf32>
    %4 = vector.multi_reduction <add>, %3, %cst [1] : vector<8x32xf32> to vector<8xf32>
    %5 = vector.shape_cast %4 : vector<8xf32> to vector<8x1xf32>
    %cst_4 = arith.constant 3.200000e+01 : f32
    %6 = vector.broadcast %cst_4 : f32 to vector<8x1xf32>
    %7 = arith.divf %5, %6 : vector<8x1xf32>
    %cst_5 = arith.constant 9.99999997E-7 : f32
    %8 = vector.broadcast %cst_5 : f32 to vector<8x1xf32>
    %9 = arith.addf %7, %8 : vector<8x1xf32>
    %10 = math.rsqrt %9 : vector<8x1xf32>
    %11 = vector.broadcast %10 : vector<8x1xf32> to vector<8x32xf32>
    %12 = arith.mulf %1, %11 : vector<8x32xf32>
    %13 = vector.broadcast %2 : vector<1x32xf32> to vector<8x32xf32>
    %14 = arith.mulf %12, %13 : vector<8x32xf32>
    %15 = arith.truncf %14 : vector<8x32xf32> to vector<8x32xbf16>
    %c0_6 = arith.constant 0 : index
    %c0_7 = arith.constant 0 : index
    %16 = vector.load %arg6[%c0_6, %c0_7] : memref<32x64xbf16, #tpu.memory_space<vmem>>, vector<32x64xbf16>
    %cst_8 = arith.constant dense<0.000000e+00> : vector<8x64xf32>
    %17 = tpu.matmul %15, %16, %cst_8 {dimension_numbers = #tpu.dot_dimension_numbers<[1], [0], [0], [1], [0, 0, 1, 1], [], []>} : vector<8x32xbf16>, vector<32x64xbf16>, vector<8x64xf32> -> vector<8x64xf32>
    %c0_9 = arith.constant 0 : index
    %c0_10 = arith.constant 0 : index
    %18 = vector.load %arg3[%c0_9, %c0_10] : memref<8x16xf32, #tpu.memory_space<vmem>>, vector<8x16xf32>
    %c0_11 = arith.constant 0 : index
    %c0_12 = arith.constant 0 : index
    %19 = vector.load %arg4[%c0_11, %c0_12] : memref<8x16xf32, #tpu.memory_space<vmem>>, vector<8x16xf32>
    %20 = vector.extract_strided_slice %17 {offsets = [0, 0], sizes = [8, 16], strides = [1, 1]} : vector<8x64xf32> to vector<8x16xf32>
    %21 = vector.extract_strided_slice %17 {offsets = [0, 16], sizes = [8, 16], strides = [1, 1]} : vector<8x64xf32> to vector<8x16xf32>
    %22 = vector.extract_strided_slice %17 {offsets = [0, 32], sizes = [8, 32], strides = [1, 1]} : vector<8x64xf32> to vector<8x32xf32>
    %23 = arith.mulf %20, %18 : vector<8x16xf32>
    %24 = arith.mulf %21, %19 : vector<8x16xf32>
    %25 = arith.subf %23, %24 : vector<8x16xf32>
    %26 = arith.mulf %20, %19 : vector<8x16xf32>
    %27 = arith.mulf %21, %18 : vector<8x16xf32>
    %28 = arith.addf %26, %27 : vector<8x16xf32>
    %29 = vector.shape_cast %25 : vector<8x16xf32> to vector<8x4x4xf32>
    %30 = vector.shape_cast %28 : vector<8x16xf32> to vector<8x4x4xf32>
    %31 = tpu.concatenate %29, %30 in 2 : vector<8x4x4xf32>, vector<8x4x4xf32> -> vector<8x4x8xf32>
    %32 = tpu.transpose %31, [1, 0, 2] : vector<8x4x8xf32> -> vector<4x8x8xf32>
    %33 = arith.truncf %32 : vector<4x8x8xf32> to vector<4x8x8xbf16>
    %c0_13 = arith.constant 0 : index
    %c0_14 = arith.constant 0 : index
    %c0_15 = arith.constant 0 : index
    %c0_16 = arith.constant 0 : index
    %34 = vector.load %arg7[%c0_13, %c0_14, %c0_15, %c0_16] : memref<1x4x8x8xbf16, #tpu.memory_space<vmem>>, vector<1x4x8x8xbf16>
    %35 = vector.shape_cast %34 : vector<1x4x8x8xbf16> to vector<4x8x8xbf16>
    %36 = vector.shape_cast %33 : vector<4x8x8xbf16> to vector<1x4x8x8xbf16>
    tpu.vector_store %arg7[%c0_13, %c0_14, %c0_15, %c0_16], %36 {strides = array<i32>} : memref<1x4x8x8xbf16, #tpu.memory_space<vmem>>, vector<1x4x8x8xbf16>,
    %37 = vector.shape_cast %22 : vector<8x32xf32> to vector<8x4x8xf32>
    %38 = tpu.transpose %37, [1, 0, 2] : vector<8x4x8xf32> -> vector<4x8x8xf32>
    %39 = arith.truncf %38 : vector<4x8x8xf32> to vector<4x8x8xbf16>
    %c0_17 = arith.constant 0 : index
    %c0_18 = arith.constant 0 : index
    %c0_19 = arith.constant 0 : index
    %c0_20 = arith.constant 0 : index
    %40 = vector.load %arg8[%c0_17, %c0_18, %c0_19, %c0_20] : memref<1x4x8x8xbf16, #tpu.memory_space<vmem>>, vector<1x4x8x8xbf16>
    %41 = vector.shape_cast %40 : vector<1x4x8x8xbf16> to vector<4x8x8xbf16>
    %42 = vector.shape_cast %39 : vector<4x8x8xbf16> to vector<1x4x8x8xbf16>
    tpu.vector_store %arg8[%c0_17, %c0_18, %c0_19, %c0_20], %42 {strides = array<i32>} : memref<1x4x8x8xbf16, #tpu.memory_space<vmem>>, vector<1x4x8x8xbf16>,
    return
  }
  func.func @transform_0(%arg0: i32, %arg1: i32) -> (i32, i32, i32) {
    %c0_i32 = arith.constant 0 : i32
    %c0_i32_0 = arith.constant 0 : i32
    return %arg0, %arg1, %c0_i32 : i32, i32, i32
  }
  func.func @transform_1(%arg0: i32, %arg1: i32) -> (i32, i32) {
    %c0_i32 = arith.constant 0 : i32
    %c0_i32_0 = arith.constant 0 : i32
    return %arg1, %c0_i32 : i32, i32
  }
  func.func @transform_2(%arg0: i32, %arg1: i32) -> (i32, i32) {
    %c0_i32 = arith.constant 0 : i32
    %c0_i32_0 = arith.constant 0 : i32
    return %arg1, %c0_i32 : i32, i32
  }
  func.func @transform_3(%arg0: i32, %arg1: i32) -> (i32, i32) {
    %c0_i32 = arith.constant 0 : i32
    %c0_i32_0 = arith.constant 0 : i32
    %c0_i32_1 = arith.constant 0 : i32
    return %c0_i32, %c0_i32_0 : i32, i32
  }
  func.func @transform_4(%arg0: i32, %arg1: i32) -> (i32, i32) {
    %c0_i32 = arith.constant 0 : i32
    %c0_i32_0 = arith.constant 0 : i32
    %c0_i32_1 = arith.constant 0 : i32
    return %c0_i32, %c0_i32_0 : i32, i32
  }
  func.func @transform_5(%arg0: i32, %arg1: i32) -> (i32, i32, i32, i32) {
    %c0_i32 = arith.constant 0 : i32
    %c0_i32_0 = arith.constant 0 : i32
    %c0_i32_1 = arith.constant 0 : i32
    return %arg0, %c0_i32, %arg1, %c0_i32_0 : i32, i32, i32, i32
  }
  func.func @transform_6(%arg0: i32, %arg1: i32) -> (i32, i32, i32, i32) {
    %c0_i32 = arith.constant 0 : i32
    %c0_i32_0 = arith.constant 0 : i32
    %c0_i32_1 = arith.constant 0 : i32
    return %arg0, %c0_i32, %arg1, %c0_i32_0 : i32, i32, i32, i32
  }
}

</mosaic_0001>

<bundles_post_ra>
// kernel: tpu_custom_call.1
= control target key start
LH: loop header
LB: loop body
LE: loop exit
PB: predicated region body
PF: predicated region fallthrough
CT: control target
= control target key end

     0   :  { %s2036_s0 = inlined_call_operand.hbm [shape: f32[2,8,32], index: 0, kind: input, shape index: {}]   ;;  %s2037_s1 = inlined_call_operand.hbm [shape: f32[8,16], index: 1, kind: input, shape index: {}]   ;;  %s2038_s2 = inlined_call_operand.hbm [shape: f32[8,16], index: 2, kind: input, shape index: {}]   ;;  %s2039_s3 = inlined_call_operand.hbm [shape: f32[1,32], index: 3, kind: input, shape index: {}]   ;;  %s2040_s4 = inlined_call_operand.hbm [shape: bf16[32,64], index: 4, kind: input, shape index: {}]   ;;  %s2041_s5 = inlined_call_operand.hbm [shape: bf16[2,4,8,8], index: 5, kind: output, shape index: {0}]   ;;  %s2042_s6 = inlined_call_operand.hbm [shape: bf16[2,4,8,8], index: 6, kind: output, shape index: {1}]  }
   0x1   :  { %2047 = sst [smem:[#allocation19_spill]] %s2037_s1 }
   0x2   :  { %12 = vsyncpa [#allocation3], 0 }
   0x3   :  { %14 = vsyncpa [#allocation3 + $0x1], 0 }
   0x4   :  { %15 = vsyncpa [#allocation6], 0 }
   0x5   :  { %16 = vsyncpa [#allocation9], 0 }
   0x6   :  { %17 = vsyncpa [#allocation4], 0 }
   0x7   :  { %19 = vsyncpa [#allocation4 + $0x1], 0 }
   0x8   :  { %20 = vsyncpa [#allocation13], 0 }
   0x9   :  { %22 = vsyncpa [#allocation13 + $0x1], 0  ;;  %s1596_s21 = smov 0   ;;  %s1598_s22 = smov 0  }
   0xa   :  { %s1600_s23 = smov 0   ;;  %s1602_s24 = smov 0  }
   0xb   :  { %s1604_s25 = smov 0   ;;  %s1606_s26 = smov 0  }
   0xc LB: > { %s1101_s27 = sadd.s32 4294967295, %s1537_s26   ;;  %p1103_p0 = scmp.ge.s32.totalorder %s1537_s26, 1  ;;  %s1537_s26 = sphi %s1606_s26, %s28_s26   ;;  %s1533_s25 = sphi %s1604_s25, %s2068_s25   ;;  %s1529_s24 = sphi %s1602_s24, %s2067_s24   ;;  %s1525_s23 = sphi %s1600_s23, %s2066_s23   ;;  %s1521_s22 = sphi %s1598_s22, %s2065_s22   ;;  %s1517_s21 = sphi %s1596_s21, %s2064_s21  }
   0xd   : > { %p1630_p1 = scmp.eq.s32.totalorder %s1101_s27, 0  ;;  %p223_p2 = scmp.lt.s32.totalorder %s1537_s26, 3 }
   0xe   : > { %s1539_s30 = smov [#allocation5]   ;;  %s1540_s8 = smov [#allocation8]  }
   0xf   : > { %s2048_s28 = scalar_select %p1630_p1, 1, 0 }
  0x10   : > { %p1635_p3 = pnand %p1103_p0, %p223_p2  ;;  %s238_s7 = sshll.u32 %s1539_s30, 4  ;;  %s239_s7 = int_to_ptr.vmem [resolvable:$true] %s238_s7 }
  0x11   : > { %s262_s9 = sshll.u32 %s1540_s8, 4  ;;  %s1541_s11 = smov [#allocation7]   ;;  %s1648_s9 = int_to_ptr.vmem [resolvable:$true] %s262_s9 }
  0x12   : > { %s2049_s29 = scalar_select %p1635_p3, 1, 0 }
  0x13   : > { %p1168_p5 = pneg %p1635_p3  ;;  %s251_s12 = sshll.u32 %s1541_s11, 4  ;;  %s1650_s12 = int_to_ptr.vmem [resolvable:$true] %s251_s12 }
  0x14   : > { %s2051_s1 = sld [smem:[#allocation19_spill]] }
  0x15   : > { %p1644_p6 = pnand %p1168_p5, %p1630_p1 }
  0x17   : > { %p1660_p8 = pneg %p1644_p6 }
  0x1a   : > { %s1273_s15 = scalar_lea.hbm %s2051_s1, 128 }
  0x1b   : > { %p1274_p7 = scmp.ne.s32.totalorder %s2051_s1, %s1273_s15  ;;  %p1280_p11 = scmp.lt.u32.totalorder %s1273_s15, %s2051_s1 }
  0x1d   : > { %p1276_p9 = pnand %p1660_p8, %p1274_p7 }
  0x1f   : > { %p1277_p10 = pneg %p1276_p9 }
  0x21   : > { %p1282_p12 = pnand %p1280_p11, %p1277_p10 }
  0x23   : > { %1285 = shalt.err (!%p1282_p12)
}
  0x24   : > { %s1286_s30 = scalar_lea.vmem %s239_s7, 128  ;;  %p1294_p5 = scmp.lt.s32.totalorder %s239_s7, %s239_s7 }
  0x25   : > { %p1287_p13 = scmp.ne.s32.totalorder %s239_s7, %s1286_s30  ;;  %p1295_p4 = scmp.lt.s32.totalorder %s1286_s30, %s1286_s30 }
  0x27   : > { %p1289_p0 = pnand %p1287_p13, %p1660_p8  ;;  %p1296_p3 = por %p1295_p4, %p1294_p5 }
  0x29   : > { %p1290_p2 = pneg %p1289_p0 }
  0x2b   : > { %p1297_p1 = pnand %p1296_p3, %p1290_p2 }
  0x2d   : > { %1300 = shalt.err (!%p1297_p1)
}
  0x2e   : > { %1171 = dma.hbm_to_vmem [thread:$0]  (!%p1644_p6), %s2051_s1, 128, %s239_s7, [#allocation6]  }
  0x2f   : > { %s1301_s15 = scalar_lea.hbm %s2039_s3, 16 }
  0x30   : > { %p1302_p7 = scmp.ne.s32.totalorder %s2039_s3, %s1301_s15  ;;  %p1308_p1 = scmp.lt.u32.totalorder %s1301_s15, %s2039_s3 }
  0x32   : > { %p1304_p9 = pnand %p1302_p7, %p1660_p8 }
  0x34   : > { %p1305_p4 = pneg %p1304_p9 }
  0x36   : > { %p1310_p3 = pnand %p1308_p1, %p1305_p4 }
  0x38   : > { %1313 = shalt.err (!%p1310_p3)
}
  0x39   : > { %s1314_s7 = scalar_lea.vmem %s1648_s9, 16  ;;  %s1321_s30 = scalar_lea.vmem %s1648_s9, 32 }
  0x3a   : > { %p1315_p10 = scmp.ne.s32.totalorder %s1648_s9, %s1314_s7  ;;  %p1322_p13 = scmp.lt.s32.totalorder %s1648_s9, %s1648_s9 }
  0x3b   : > { %p1323_p0 = scmp.lt.s32.totalorder %s1321_s30, %s1314_s7 }
  0x3c   : > { %p1317_p11 = pnand %p1315_p10, %p1660_p8 }
  0x3d   : > { %p1324_p2 = por %p1323_p0, %p1322_p13 }
  0x3e   : > { %p1318_p12 = pneg %p1317_p11 }
  0x40   : > { %p1325_p5 = pnand %p1324_p2, %p1318_p12 }
  0x42   : > { %1328 = shalt.err (!%p1325_p5)
}
  0x43   : > { %1177 = dma.hbm_to_vmem [thread:$0]  (!%p1644_p6), %s2039_s3, 16, %s1648_s9, [#allocation9]  }
  0x44   : > { %s1329_s15 = scalar_lea.hbm %s2038_s2, 128 }
  0x45   : > { %p1330_p7 = scmp.ne.s32.totalorder %s2038_s2, %s1329_s15  ;;  %p1336_p1 = scmp.lt.u32.totalorder %s1329_s15, %s2038_s2 }
  0x47   : > { %p1332_p9 = pnand %p1330_p7, %p1660_p8 }
  0x49   : > { %p1333_p4 = pneg %p1332_p9 }
  0x4b   : > { %p1338_p3 = pnand %p1336_p1, %p1333_p4 }
  0x4d   : > { %1341 = shalt.err (!%p1338_p3)
}
  0x4e   : > { %s1342_s9 = scalar_lea.vmem %s1650_s12, 128  ;;  %p1350_p13 = scmp.lt.s32.totalorder %s1650_s12, %s1650_s12 }
  0x4f   : > { %p1343_p10 = scmp.ne.s32.totalorder %s1650_s12, %s1342_s9  ;;  %p1351_p0 = scmp.lt.s32.totalorder %s1342_s9, %s1342_s9 }
  0x51   : > { %p1345_p11 = pnand %p1343_p10, %p1660_p8  ;;  %p1352_p2 = por %p1351_p0, %p1350_p13 }
  0x53   : > { %p1346_p12 = pneg %p1345_p11 }
  0x55   : > { %p1353_p5 = pnand %p1352_p2, %p1346_p12 }
  0x57   : > { %1356 = shalt.err (!%p1353_p5)
}
  0x58   : > { %1174 = dma.hbm_to_vmem [thread:$0]  (!%p1644_p6), %s2038_s2, 128, %s1650_s12, [#allocation6]  }
  0x59   : > { %s1542_s8 = smov [#allocation10]   ;;  %s1357_s15 = scalar_lea.hbm %s2040_s4, 256 }
  0x5a   : > { %s272_s11 = sshll.u32 %s1542_s8, 4  ;;  %p1358_p7 = scmp.ne.s32.totalorder %s2040_s4, %s1357_s15  ;;  %s273_s11 = int_to_ptr.vmem [resolvable:$true] %s272_s11 }
  0x5b   : > { %p1364_p1 = scmp.lt.u32.totalorder %s1357_s15, %s2040_s4 }
  0x5c   : > { %p1360_p9 = pnand %p1358_p7, %p1660_p8 }
  0x5e   : > { %p1361_p4 = pneg %p1360_p9 }
  0x60   : > { %p1366_p3 = pnand %p1364_p1, %p1361_p4 }
  0x62   : > { %1369 = shalt.err (!%p1366_p3)
}
  0x63   : > { %s1370_s12 = scalar_lea.vmem %s273_s11, 256  ;;  %p1378_p13 = scmp.lt.s32.totalorder %s273_s11, %s273_s11 }
  0x64   : > { %p1371_p10 = scmp.ne.s32.totalorder %s273_s11, %s1370_s12  ;;  %p1379_p0 = scmp.lt.s32.totalorder %s1370_s12, %s1370_s12 }
  0x66   : > { %p1373_p11 = pnand %p1371_p10, %p1660_p8  ;;  %p1380_p2 = por %p1379_p0, %p1378_p13 }
  0x68   : > { %p1374_p12 = pneg %p1373_p11 }
  0x6a   : > { %p1381_p5 = pnand %p1380_p2, %p1374_p12 }
  0x6c   : > { %1384 = shalt.err (!%p1381_p5)
}
  0x6d   : > { %s1543_s9 = smov 64   ;;  %s1544_s18 = smov 4  }
  0x6e   : > { %1180 = dma.hbm_to_vmem [thread:$0]  (!%p1644_p6), %s2040_s4, 256, %s273_s11, [#allocation9], %s1543_s9, %s1543_s9, %s1544_s18  }
  0x6f   : > { %s1102_s8 = sadd.s32 4294967294, %s1537_s26   ;;  %s40_s13 = sadd.s32 1, %s1533_s25 }
  0x70   : > { %p42_p8 = scmp.ge.s32.totalorder %s40_s13, 2  ;;  %s49_s14 = sadd.s32 1, %s1525_s23 }
  0x71   : > { %p56_p7 = scmp.ne.s32.totalorder %s1525_s23, %s1521_s22  ;;  %p57_p9 = scmp.eq.s32.totalorder %s1537_s26, 0 }
  0x72   : > { %s2070_s13 = smov (%p42_p8, %s40_s13), 0  ;;  %p62_p1 = scmp.ne.s32.totalorder %s1521_s22, %s1517_s21 }
  0x73   : > { %p1749_p4 = por %p57_p9, %p56_p7  ;;  %s44_s10 = ssub.s32 %s1533_s25, %s2070_s13 }
  0x74   : > { %p182_p6 = scmp.eq.s32.totalorder %s1101_s27, 1  ;;  %p47_p3 = scmp.eq.s32.totalorder %s44_s10, 0 }
  0x75   : > { %p2054_p10 = scmp.ne.s32.totalorder %s2048_s28, 0  ;;  %p188_p13 = scmp.eq.s32.totalorder %s1102_s8, 1 }
  0x76   : > { %p1765_p12 = por %p182_p6, %p56_p7  ;;  %p1196_p2 = scmp.lt.s32.totalorder %s1537_s26, 2 }
  0x77   : > { %p1761_p11 = por %p2054_p10, %p62_p1  ;;  %p1772_p0 = por %p188_p13, %p62_p1 }
  0x78   : > { %s2056_s16 = scalar_select %p1765_p12, 1, 0 }
  0x79   : > { %s1770_s17 = scalar_select %p47_p3, %s1525_s23, %s49_s14  }
  0x7a   : > { %s2057_s19 = scalar_select %p1772_p0, 1, 0 }
  0x7b   : > { %s286_s20 = sand.u32 1, %s1525_s23   ;;  %s1110_s27 = sshll.u32 %s1533_s25, 7 }
  0x7c   : > { %s1109_s12 = sshll.u32 %s286_s20, 3  ;;  %s1782_s7 = scalar_lea.hbm %s2036_s0, %s1110_s27 }
  0x7d   : > { %s290_s30 = scalar_lea.vmem [#allocation2], %s1109_s12  ;;  %p1786_p5 = pnand %p1196_p2, %p1749_p4 }
  0x7e   : > { %s298_s8 = sshll.u32 %s290_s30, 4  ;;  %s287_s10 = scalar_lea.sflag [#allocation3], %s286_s20  ;;  %s1790_s8 = int_to_ptr.vmem [resolvable:$true] %s298_s8 }
  0x7f   : > { %s1385_s1 = scalar_lea.hbm %s1782_s7, 128  ;;  %p1387_p7 = pneg %p1786_p5 }
  0x80   : > { %p1386_p8 = scmp.ne.s32.totalorder %s1782_s7, %s1385_s1  ;;  %s1390_s15 = scalar_lea.hbm %s2036_s0, 256 }
  0x81   : > { %p1391_p4 = scmp.lt.u32.totalorder %s1782_s7, %s2036_s0  ;;  %p1392_p6 = scmp.lt.u32.totalorder %s1390_s15, %s1385_s1 }
  0x82   : > { %p1388_p9 = pnand %p1387_p7, %p1386_p8  ;;  %p1394_p10 = scmp.lt.u32.totalorder %s1385_s1, %s1782_s7 }
  0x83   : > { %p1393_p3 = por %p1392_p6, %p1391_p4 }
  0x84   : > { %p1389_p1 = pneg %p1388_p9 }
  0x85   : > { %p1395_p13 = por %p1394_p10, %p1393_p3 }
  0x87   : > { %p1396_p2 = pnand %p1395_p13, %p1389_p1 }
  0x89   : > { %1399 = shalt.err (!%p1396_p2)
}
  0x8a   : > { %s1400_s20 = scalar_lea.vmem %s1790_s8, 128  ;;  %s1545_s30 = smov [#allocation2]  }
  0x8b   : > { %p1401_p8 = scmp.ne.s32.totalorder %s1790_s8, %s1400_s20  ;;  %s1405_s27 = sshll.u32 %s1545_s30, 4  ;;  %s1406_s27 = int_to_ptr.vmem [resolvable:$false] %s1405_s27 }
  0x8c   : > { %s1407_s12 = scalar_lea.vmem %s1406_s27, 256  ;;  %p1408_p12 = scmp.lt.s32.totalorder %s1790_s8, %s1406_s27 }
  0x8d   : > { %p1403_p9 = pnand %p1401_p8, %p1387_p7  ;;  %p1409_p4 = scmp.lt.s32.totalorder %s1407_s12, %s1400_s20 }
  0x8f   : > { %p1404_p0 = pneg %p1403_p9  ;;  %p1410_p6 = por %p1409_p4, %p1408_p12 }
  0x91   : > { %p1411_p3 = pnand %p1410_p6, %p1404_p0 }
  0x93   : > { %1414 = shalt.err (!%p1411_p3)
}
  0x94   : > { %1184 = dma.hbm_to_vmem [thread:$0]  (!%p1786_p5), %s1782_s7, 128, %s1790_s8, %s287_s10  }
  0x95   : > { %p2059_p1 = scmp.ne.s32.totalorder %s2049_s29, 0 }
  0x96   : > { %s1820_s1 = sand.u32 (!%p2059_p1), 1, %s1521_s22  }
  0x97   : > { %307 = sbr.rel (%p2059_p1) target bundleno = 968 (0x3c8), region = 40  ;;  %s1112_s15 = sshll.u32 (!%p2059_p1), %s1820_s1, 3 }
  0x98   : > { %s310_s9 = scalar_lea.sflag (!%p2059_p1), [#allocation3], %s1820_s1  ;;  %s313_s18 = scalar_lea.vmem (!%p2059_p1), [#allocation2], %s1112_s15 }
  0x9e   : > { %1496 = dma.done.wait (%p1761_p11), %s310_s9, 128  }
  0x9f   : > { %1498 = vsyncadd (%p1761_p11), %s310_s9, 4294967168  ;;  %p2060_p12 = scmp.ne.s32.totalorder %s2048_s28, 0 }
  0xa1   : > { %1500 = dma.done.wait (%p2060_p12), [#allocation6], 256  }
  0xa2   : > { %1502 = vsyncadd (%p2060_p12), [#allocation6], 4294967040 }
  0xa3   : > { %1504 = dma.done.wait (%p2060_p12), [#allocation9], 272  }
  0xa4   : > { %1506 = vsyncadd (%p2060_p12), [#allocation9], 4294967024  ;;  %v364_v0 = vld [vmem:[%s313_s18] sm:$0xff]  ;;  %vm367_vm0 = vcmask 261120   ;;  %v1546_v4 = vmov 0.0   ;;  %vm1547_vm1 = vmmov 0   ;;  %v482_v34 = vlaneseq }
  0xa5   : > { %v366_v1 = vmul.f32 %v364_v0, %v364_v0  ;;  %v1269_v3 = vld [vmem:[#allocation10] sm:$0xff]   ;;  %1138 = vmatprep.subr.bf16.mxu0 %v1546_v4  ;;  %1142 = vmatprep.mubr.msk.bf16.mxu0 %vm1547_vm1, %v1546_v4  ;;  %v1270_v5 = vld [vmem:[#allocation10 + $0x8] sm:$0xff]   ;;  %v444_v6 = vld [vmem:[#allocation7] sm:$0xff]  ;;  %s1548_s28 = smov 16   ;;  %s1549_s29 = smov 112   ;;  %vm655_vm2 = vcmask 31744  }
  0xa6   : > { %1139 = vmatpush3.bf16.msra.mxu0 %v1269_v3  ;;  %v443_v7 = vld [vmem:[#allocation5] sm:$0xff]  ;;  %447 = vrot.lane.b32.xlu1 %v444_v6, %s1548_s28  ;;  %v1119_v12 = vld [vmem:[#allocation8] ss:$0 sm:$0xff]  ;;  %s1550_s11 = smov 120   ;;  %s1551_s7 = smov 124   ;;  %v483_v37 = vshrl.u32 %v482_v34, 7 }
  0xa7   : > { %v368_v2 = vsel %vm367_vm0, %v366_v1, 0.0  ;;  %1140 = vmatprep.subr.bf16.mxu0 %v1546_v4  ;;  %s1552_s8 = smov 96   ;;  %s1553_s14 = smov 116   ;;  %v1555_v32 = vmov 1983009808   ;;  %vm736_vm3 = vcmask 60416  }
  0xa8   : > { %369 = vadd.xlane.f32.xlu0 %v368_v2  ;;  %s1554_s10 = smov 104   ;;  %v480_v33 = vunpack.c.l.s4 %v1555_v32  ;;  %v1556_v38 = vmov 1934713408   ;;  %s1557_s20 = smov 4  }
  0xa9   : > { %v512_v39 = vunpack.c.l.s4 %v1556_v38  ;;  %s1117_s30 = sshll.u32 %s1820_s1, 4  ;;  %s1133_s27 = sshll.u32 %s1529_s24, 8 }
  0xaa   : > { %1141 = vmatpush3.bf16.msra.mxu0 %v1270_v5  ;;  %v481_v36 = vunpack.c.0.s8 %v480_v33  ;;  %s362_s12 = scalar_lea.vmem [#allocation12], %s1117_s30  ;;  %p2061_p0 = scmp.ne.s32.totalorder %s2056_s16, 0 }
  0xab   : > { %v513_v43 = vunpack.c.0.s8 %v512_v39  ;;  %s941_s15 = sshll.u32 %s362_s12, 4  ;;  %s1919_s15 = int_to_ptr.vmem [resolvable:$true] %s941_s15 }
  0xac   : > { %v1849_v41 = vsub.s32 %v481_v36, %v483_v37 }
  0xad   : > { %v1853_v49 = vsub.s32 %v513_v43, %v483_v37 }
  0xbe   : > { %458 = vrot.lane.b32.xlu0 %v443_v7, %s1548_s28  ;;  %s1917_s28 = scalar_lea.hbm %s2042_s6, %s1133_s27 }
 0x118   : > { %v448_v22 = vpop.permute.xlu1 %447 }
 0x135   : > { %v370_v8 = vpop.xlane.xlu0 %369 }
 0x136   : > { %v372_v9 = vmul.f32 0.03125, %v370_v8 }
 0x138   : > { %v373_v10 = vadd.f32 1e-06, %v372_v9 }
 0x139   : > { %v459_v16 = vpop.permute.xlu0 %458 }
 0x13a   : > { %1271 = vrsqrt.f32 %v373_v10 }
 0x144   : > { %v1272_v11 = vpop.eup %1271 }
 0x145   : > { %v375_v13 = vmul.f32 %v1272_v11, %v364_v0 }
 0x147   : > { %v382_v14 = vmul.f32 %v1119_v12, %v375_v13 }
 0x149   : > { %v383_v15 = vpack.c.bf16 %v382_v14, %v382_v14 }
 0x14b   : > { %1143 = vmatmul.mubr.msk.bf16.vlgmr.msra.gmra.mrb[0].mxu0 %vm367_vm0, %v383_v15 }
 0x21e   : > { %v437_v17 = vpop.f32.mrb[0].mxu0 }
 0x21f   : > { %v461_v18 = vmul.f32 %v459_v16, %v437_v17  ;;  %744 = vrot.lane.b32.xlu0 %v437_v17, %s1549_s29  ;;  %v1144_v19 = vpop.f32.mrb[1].mxu0  ;;  %v450_v23 = vmul.f32 %v448_v22, %v437_v17  ;;  %v456_v24 = vmul.f32 %v444_v6, %v437_v17  ;;  %v445_v30 = vmul.f32 %v443_v7, %v437_v17 }
 0x220   : > { %v440_v20 = vpop.f32.mrb[2].mxu0 }
 0x221   : > { %v1145_v21 = vpop.f32.mrb[3].mxu0  ;;  %463 = vrot.lane.b32.xlu1 %v461_v18, %s1549_s29 }
 0x225   : > { %742 = vrot.lane.b32.xlu1 %v437_v17, %s1550_s11 }
 0x229   : > { %452 = vrot.lane.b32.xlu1 %v450_v23, %s1549_s29  ;;  %s910_s29 = scalar_lea.sflag [#allocation13], %s1820_s1 }
 0x291   : > { %v745_v28 = vpop.permute.xlu0 %744 }
 0x293   : > { %v464_v25 = vpop.permute.xlu1 %463 }
 0x294   : > { %v466_v26 = vadd.f32 %v464_v25, %v456_v24 }
 0x296   : > { %546 = vrot.lane.b32.xlu1 %v466_v26, %s1551_s7 }
 0x297   : > { %v743_v27 = vpop.permute.xlu1 %742 }
 0x298   : > { %750 = vrot.lane.b32.xlu0 %v743_v27, %s1552_s8 }
 0x29a   : > { %549 = vrot.lane.b32.xlu1 %v466_v26, %s1550_s11 }
 0x29b   : > { %v453_v29 = vpop.permute.xlu1 %452 }
 0x29c   : > { %v1846_v31 = vsub.f32 %v445_v30, %v453_v29 }
 0x29e   : > { %552 = vrot.lane.b32.xlu1 %v466_v26, %s1553_s14 }
 0x2a2   : > { %746 = vrot.lane.b32.xlu1 %v437_v17, %s1554_s10 }
 0x2a6   : > { %748 = vrot.lane.b32.xlu1 %v437_v17, %s1552_s8 }
 0x2aa   : > { %752 = vrot.lane.b32.xlu1 %v745_v28, %s1552_s8 }
 0x2ae   : > { %471 = vrot.lane.b32.xlu1 %v1846_v31, %s1550_s11  ;;  %s1415_s11 = scalar_lea.vmem %s1919_s15, 256 }
 0x2af   : > { %p1416_p11 = scmp.ne.s32.totalorder %s1919_s15, %s1415_s11 }
 0x2b1   : > { %p1417_p5 = pnand %p1416_p11, %p2061_p0 }
 0x2b3   : > { %p1418_p7 = pneg %p1417_p5 }
 0x308   : > { %v547_v35 = vpop.permute.xlu1 %546 }
 0x30a   : > { %v751_v5 = vpop.permute.xlu0 %750 }
 0x30c   : > { %v550_v40 = vpop.permute.xlu1 %549 }
 0x30d   : > { %v555_v42 = vcombine.low %v466_v26, %v550_v40  ;;  %v556_v51 = vcombine.high %v466_v26, %v550_v40 }
 0x30f   : > { %v563_v46 = vrot.slane %v555_v42, %v1849_v41  ;;  %v570_v56 = vrot.slane %v556_v51, %v1849_v41 }
 0x310   : > { %v553_v44 = vpop.permute.xlu1 %552 }
 0x311   : > { %v571_v45 = vcombine.low %v547_v35, %v553_v44  ;;  %v572_v47 = vcombine.high %v547_v35, %v553_v44 }
 0x313   : > { %v579_v48 = vrot.slane %v571_v45, %v1849_v41  ;;  %v586_v53 = vrot.slane %v572_v47, %v1849_v41 }
 0x314   : > { %v747_v50 = vpop.permute.xlu1 %746 }
 0x315   : > { %v587_v52 = vcombine.low %v563_v46, %v579_v48  ;;  %754 = vrot.lane.b32.xlu0 %v747_v50, %s1552_s8  ;;  %v588_v54 = vcombine.high %v563_v46, %v579_v48  ;;  %v603_v57 = vcombine.low %v570_v56, %v586_v53  ;;  %v604_v59 = vcombine.high %v570_v56, %v586_v53 }
 0x317   : > { %v595_v55 = vrot.slane %v587_v52, %v1853_v49  ;;  %v602_v58 = vrot.slane %v588_v54, %v1853_v49  ;;  %v611_v61 = vrot.slane %v603_v57, %v1853_v49  ;;  %v618_v63 = vrot.slane %v604_v59, %v1853_v49 }
 0x318   : > { %v749_v2 = vpop.permute.xlu1 %748 }
 0x319   : > { %468 = vrot.lane.b32.xlu0 %v1846_v31, %s1551_s7  ;;  %631 = vrot.lane.b32.xlu1 %v595_v55, %s1557_s20  ;;  %v619_v60 = vcombine.high %v595_v55, %v1546_v4  ;;  %v620_v62 = vcombine.high %v602_v58, %v1546_v4  ;;  %v621_v0 = vcombine.high %v611_v61, %v1546_v4  ;;  %s1558_s7 = smov [#allocation12]  }
 0x31a   : > { %v622_v1 = vcombine.high %v618_v63, %v1546_v4  ;;  %s1419_s8 = sshll.u32 %s1558_s7, 4  ;;  %s1420_s8 = int_to_ptr.vmem [resolvable:$false] %s1419_s8 }
 0x31b   : > { %p1422_p10 = scmp.lt.s32.totalorder %s1919_s15, %s1420_s8 }
 0x31c   : > { %v753_v3 = vpop.permute.xlu1 %752 }
 0x31d   : > { %474 = vrot.lane.b32.xlu0 %v1846_v31, %s1553_s14  ;;  %635 = vrot.lane.b32.xlu1 %v602_v58, %s1557_s20  ;;  %v760_v6 = vcombine.low %v749_v2, %v753_v3  ;;  %v761_v7 = vcombine.high %v749_v2, %v753_v3  ;;  %s1421_s14 = scalar_lea.vmem %s1420_s8, 512 }
 0x31e   : > { %p1423_p13 = scmp.lt.s32.totalorder %s1421_s14, %s1415_s11 }
 0x31f   : > { %v768_v12 = vrot.slane %v760_v6, %v1849_v41  ;;  %v775_v13 = vrot.slane %v761_v7, %v1849_v41 }
 0x320   : > { %v472_v8 = vpop.permute.xlu1 %471  ;;  %p1424_p2 = por %p1423_p13, %p1422_p10 }
 0x321   : > { %633 = vrot.lane.b32.xlu0 %v619_v60, %s1557_s20  ;;  %639 = vrot.lane.b32.xlu1 %v611_v61, %s1557_s20  ;;  %v477_v26 = vcombine.low %v1846_v31, %v472_v8  ;;  %v478_v27 = vcombine.high %v1846_v31, %v472_v8 }
 0x322   : > { %p1425_p8 = pnand %p1424_p2, %p1418_p7 }
 0x323   : > { %v485_v31 = vrot.slane %v477_v26, %v1849_v41  ;;  %v492_v42 = vrot.slane %v478_v27, %v1849_v41 }
 0x325   : > { %637 = vrot.lane.b32.xlu0 %v620_v62, %s1557_s20  ;;  %643 = vrot.lane.b32.xlu1 %v618_v63, %s1557_s20 }
 0x329   : > { %641 = vrot.lane.b32.xlu0 %v621_v0, %s1557_s20 }
 0x32d   : > { %645 = vrot.lane.b32.xlu0 %v622_v1, %s1557_s20 }
 0x387   : > { %v755_v9 = vpop.permute.xlu0 %754 }
 0x388   : > { %v776_v10 = vcombine.low %v751_v5, %v755_v9  ;;  %v777_v11 = vcombine.high %v751_v5, %v755_v9 }
 0x38a   : > { %v784_v14 = vrot.slane %v776_v10, %v1849_v41  ;;  %v791_v15 = vrot.slane %v777_v11, %v1849_v41 }
 0x38b   : > { %v1882_v16 = vpop.permute.xlu1 %631  ;;  %v469_v17 = vpop.permute.xlu0 %468 }
 0x38c   : > { %v792_v18 = vcombine.low %v768_v12, %v784_v14  ;;  %v793_v19 = vcombine.high %v768_v12, %v784_v14  ;;  %v808_v20 = vcombine.low %v775_v13, %v791_v15  ;;  %v809_v21 = vcombine.high %v775_v13, %v791_v15 }
 0x38e   : > { %v800_v22 = vrot.slane %v792_v18, %v1853_v49  ;;  %v807_v23 = vrot.slane %v793_v19, %v1853_v49  ;;  %v816_v24 = vrot.slane %v808_v20, %v1853_v49  ;;  %v823_v25 = vrot.slane %v809_v21, %v1853_v49 }
 0x38f   : > { %v636_v28 = vpop.permute.xlu1 %635  ;;  %v475_v29 = vpop.permute.xlu0 %474 }
 0x390   : > { %v828_v30 = vcombine.low %v800_v22, %v807_v23  ;;  %v1123_v32 = vcombine.high %v800_v22, %v807_v23  ;;  %v844_v33 = vcombine.low %v816_v24, %v823_v25  ;;  %v1124_v34 = vcombine.high %v816_v24, %v823_v25 }
 0x391   : > { %v493_v35 = vcombine.low %v469_v17, %v475_v29  ;;  %v494_v36 = vcombine.high %v469_v17, %v475_v29 }
 0x392   : > { %v835_v37 = vrot.slane %v828_v30, %v1849_v41  ;;  %v843_v38 = vrot.slane %v1123_v32, %v1849_v41  ;;  %v851_v39 = vrot.slane %v844_v33, %v1849_v41  ;;  %v859_v40 = vrot.slane %v1124_v34, %v1849_v41 }
 0x393   : > { %v501_v43 = vrot.slane %v493_v35, %v1849_v41  ;;  %v508_v44 = vrot.slane %v494_v36, %v1849_v41  ;;  %v640_v45 = vpop.permute.xlu1 %639  ;;  %v634_v46 = vpop.permute.xlu0 %633 }
 0x394   : > { %v860_v47 = vcombine.low %v835_v37, %v843_v38  ;;  %v861_v48 = vcombine.high %v835_v37, %v843_v38  ;;  %v876_v50 = vcombine.low %v851_v39, %v859_v40  ;;  %v877_v51 = vcombine.high %v851_v39, %v859_v40 }
 0x395   : > { %v509_v52 = vcombine.low %v485_v31, %v501_v43  ;;  %v510_v53 = vcombine.high %v485_v31, %v501_v43  ;;  %v525_v54 = vcombine.low %v492_v42, %v508_v44  ;;  %v526_v55 = vcombine.high %v492_v42, %v508_v44 }
 0x396   : > { %v868_v56 = vrot.slane %v860_v47, %v1853_v49  ;;  %v875_v57 = vrot.slane %v861_v48, %v1853_v49  ;;  %v884_v58 = vrot.slane %v876_v50, %v1853_v49  ;;  %v891_v59 = vrot.slane %v877_v51, %v1853_v49 }
 0x397   : > { %v517_v60 = vrot.slane %v509_v52, %v1853_v49  ;;  %v524_v61 = vrot.slane %v510_v53, %v1853_v49  ;;  %v533_v62 = vrot.slane %v525_v54, %v1853_v49  ;;  %v540_v63 = vrot.slane %v526_v55, %v1853_v49  ;;  %v638_v0 = vpop.permute.xlu0 %637  ;;  %v644_v7 = vpop.permute.xlu1 %643 }
 0x398   : > { %v892_v1 = vcombine.low %v868_v56, %v884_v58  ;;  %v893_v2 = vcombine.high %v868_v56, %v884_v58  ;;  %v894_v3 = vcombine.low %v875_v57, %v891_v59  ;;  %v895_v5 = vcombine.high %v875_v57, %v891_v59 }
 0x399   : > { %v541_v6 = vcombine.high %v517_v60, %v1546_v4  ;;  %v542_v8 = vcombine.high %v524_v61, %v1546_v4  ;;  %v656_v14 = vsel %vm655_vm2, %v517_v60, %v1882_v16  ;;  %v658_v15 = vsel %vm655_vm2, %v524_v61, %v636_v28 }
 0x39a   : > { %v896_v9 = vpack.c.bf16 %v892_v1, %v892_v1  ;;  %v897_v10 = vpack.c.bf16 %v893_v2, %v893_v2  ;;  %v898_v11 = vpack.c.bf16 %v894_v3, %v894_v3  ;;  %v899_v12 = vpack.c.bf16 %v895_v5, %v895_v5 }
 0x39b   : > { %v657_v13 = vsel %vm655_vm2, %v541_v6, %v634_v46  ;;  %v642_v17 = vpop.permute.xlu0 %641  ;;  %v660_v18 = vsel %vm655_vm2, %v533_v62, %v640_v45  ;;  %v662_v19 = vsel %vm655_vm2, %v540_v63, %v644_v7  ;;  %v659_v20 = vsel %vm655_vm2, %v542_v8, %v638_v0 }
 0x39c   : > { %900 = vst.msk [vmem:[%s362_s12] sm:$0xf] %vm736_vm3, %v896_v9  ;;  %901 = vst.msk [vmem:[%s362_s12 + $0x4] sm:$0xf] %vm736_vm3, %v897_v10  ;;  %v664_v21 = vcombine.low %v656_v14, %v658_v15  ;;  %v672_v16 = vcombine.low %v657_v13, %v659_v20 }
 0x39d   : > { %902 = vst.msk [vmem:[%s362_s12 + $0x8] sm:$0xf] %vm736_vm3, %v898_v11  ;;  %903 = vst.msk [vmem:[%s362_s12 + $0xc] sm:$0xf] %vm736_vm3, %v899_v12 }
 0x39e   : > { %1428 = shalt.err (!%p1425_p8)
}
 0x39f   : > { %s1429_s10 = scalar_lea.hbm %s1917_s28, 256  ;;  %s1433_s18 = scalar_lea.hbm %s2042_s6, 512 }
 0x3a0   : > { %p1430_p9 = scmp.ne.s32.totalorder %s1917_s28, %s1429_s10  ;;  %p1434_p3 = scmp.lt.u32.totalorder %s1917_s28, %s2042_s6 }
 0x3a1   : > { %p1435_p1 = scmp.lt.u32.totalorder %s1433_s18, %s1429_s10  ;;  %p1437_p11 = scmp.lt.u32.totalorder %s1429_s10, %s1917_s28 }
 0x3a2   : > { %p1431_p4 = pnand %p1430_p9, %p2061_p0 }
 0x3a3   : > { %p1436_p12 = por %p1435_p1, %p1434_p3 }
 0x3a4   : > { %p1432_p6 = pneg %p1431_p4 }
 0x3a5   : > { %p1438_p5 = por %p1437_p11, %p1436_p12 }
 0x3a7   : > { %p1439_p7 = pnand %p1438_p5, %p1432_p6 }
 0x3a9   : > { %1442 = shalt.err (!%p1439_p7)
}
 0x3aa   : > { %s1559_s11 = smov 64   ;;  %v543_v22 = vcombine.high %v533_v62, %v1546_v4  ;;  %v544_v23 = vcombine.high %v540_v63, %v1546_v4  ;;  %v680_v24 = vcombine.low %v660_v18, %v662_v19  ;;  %v679_v25 = vrot.slane %v672_v16, %v1849_v41  ;;  %v646_v26 = vpop.permute.xlu0 %645  ;;  %s1978_s10 = scalar_lea.hbm %s2041_s5, %s1133_s27 }
 0x3ab   : > { %1165 = dma.vmem_to_hbm [thread:$0]  (%p2061_p0), %s1919_s15, 256, %s1917_s28, %s910_s29, %s1559_s11, %s1559_s11, %s1557_s20   ;;  %v671_v29 = vrot.slane %v664_v21, %v1849_v41 }
 0x3ac   : > { %v661_v27 = vsel %vm655_vm2, %v543_v22, %v642_v17  ;;  %v663_v28 = vsel %vm655_vm2, %v544_v23, %v646_v26  ;;  %v687_v32 = vrot.slane %v680_v24, %v1849_v41  ;;  %s355_s15 = scalar_lea.vmem [#allocation11], %s1117_s30  ;;  %s905_s30 = scalar_lea.sflag [#allocation4], %s1820_s1 }
 0x3ad   : > { %v688_v30 = vcombine.low %v661_v27, %v663_v28  ;;  %v696_v33 = vcombine.low %v671_v29, %v679_v25  ;;  %v697_v34 = vcombine.high %v671_v29, %v679_v25  ;;  %s924_s28 = sshll.u32 %s355_s15, 4  ;;  %s1560_s27 = smov [#allocation11]   ;;  %s1980_s28 = int_to_ptr.vmem [resolvable:$true] %s924_s28 }
 0x3ae   : > { %s1443_s24 = scalar_lea.vmem %s1980_s28, 256  ;;  %s1447_s12 = sshll.u32 %s1560_s27, 4  ;;  %s1448_s12 = int_to_ptr.vmem [resolvable:$false] %s1447_s12 }
 0x3af   : > { %v695_v35 = vrot.slane %v688_v30, %v1849_v41  ;;  %v704_v37 = vrot.slane %v696_v33, %v1853_v49  ;;  %v711_v38 = vrot.slane %v697_v34, %v1853_v49  ;;  %p1444_p10 = scmp.ne.s32.totalorder %s1980_s28, %s1443_s24  ;;  %s1449_s9 = scalar_lea.vmem %s1448_s12, 512 }
 0x3b0   : > { %p1450_p8 = scmp.lt.s32.totalorder %s1980_s28, %s1448_s12  ;;  %p1451_p9 = scmp.lt.s32.totalorder %s1449_s9, %s1443_s24 }
 0x3b1   : > { %v712_v36 = vcombine.low %v687_v32, %v695_v35  ;;  %v713_v4 = vcombine.high %v687_v32, %v695_v35  ;;  %p1445_p13 = pnand %p1444_p10, %p2061_p0 }
 0x3b2   : > { %p1452_p4 = por %p1451_p9, %p1450_p8 }
 0x3b3   : > { %v720_v39 = vrot.slane %v712_v36, %v1853_v49  ;;  %v727_v40 = vrot.slane %v713_v4, %v1853_v49  ;;  %p1446_p2 = pneg %p1445_p13 }
 0x3b5   : > { %v728_v31 = vcombine.low %v704_v37, %v720_v39  ;;  %v729_v42 = vcombine.high %v704_v37, %v720_v39  ;;  %v730_v43 = vcombine.low %v711_v38, %v727_v40  ;;  %v731_v41 = vcombine.high %v711_v38, %v727_v40  ;;  %p1453_p6 = pnand %p1452_p4, %p1446_p2 }
 0x3b7   : > { %v732_v44 = vpack.c.bf16 %v728_v31, %v728_v31  ;;  %v733_v45 = vpack.c.bf16 %v729_v42, %v729_v42  ;;  %v734_v46 = vpack.c.bf16 %v730_v43, %v730_v43  ;;  %v735_v47 = vpack.c.bf16 %v731_v41, %v731_v41 }
 0x3b9   : > { %737 = vst.msk [vmem:[%s355_s15] sm:$0xf] %vm736_vm3, %v732_v44  ;;  %738 = vst.msk [vmem:[%s355_s15 + $0x4] sm:$0xf] %vm736_vm3, %v733_v45 }
 0x3ba   : > { %739 = vst.msk [vmem:[%s355_s15 + $0x8] sm:$0xf] %vm736_vm3, %v734_v46  ;;  %740 = vst.msk [vmem:[%s355_s15 + $0xc] sm:$0xf] %vm736_vm3, %v735_v47 }
 0x3bb   : > { %1456 = shalt.err (!%p1453_p6)
}
 0x3bc   : > { %s1457_s18 = scalar_lea.hbm %s1978_s10, 256  ;;  %s1461_s15 = scalar_lea.hbm %s2041_s5, 512 }
 0x3bd   : > { %p1458_p3 = scmp.ne.s32.totalorder %s1978_s10, %s1457_s18  ;;  %p1462_p11 = scmp.lt.u32.totalorder %s1978_s10, %s2041_s5 }
 0x3be   : > { %p1463_p5 = scmp.lt.u32.totalorder %s1461_s15, %s1457_s18  ;;  %p1465_p10 = scmp.lt.u32.totalorder %s1457_s18, %s1978_s10 }
 0x3bf   : > { %p1459_p1 = pnand %p1458_p3, %p2061_p0 }
 0x3c0   : > { %p1464_p7 = por %p1463_p5, %p1462_p11 }
 0x3c1   : > { %p1460_p12 = pneg %p1459_p1 }
 0x3c2   : > { %p1466_p13 = por %p1465_p10, %p1464_p7 }
 0x3c4   : > { %p1467_p2 = pnand %p1466_p13, %p1460_p12 }
 0x3c6   : > { %1470 = shalt.err (!%p1467_p2)
}
 0x3c7   : > { %1164 = dma.vmem_to_hbm [thread:$0]  (%p2061_p0), %s1980_s28, 256, %s1978_s10, %s905_s30, %s1559_s11, %s1559_s11, %s1557_s20  }
 0x3c8 PF: > { %s956_s24 = sand.u32 1, %s1517_s21   ;;  %p2062_p8 = scmp.ne.s32.totalorder %s2057_s19, 0 }
 0x3c9   : > { %p2063_p9 = scmp.ge.s32.totalorder %s1537_s26, 2  ;;  %s957_s27 = scalar_lea.sflag [#allocation4], %s956_s24 }
 0x3cb   : > { %p1186_p4 = pnand %p2063_p9, %p2062_p8 }
 0x3cd   : > { %1508 = dma.done.wait (!%p1186_p4), %s957_s27, 256  }
 0x3ce   : > { %1510 = vsyncadd (!%p1186_p4), %s957_s27, 4294967040  ;;  %s966_s16 = scalar_lea.sflag [#allocation13], %s956_s24 }
 0x3cf   : > { %1512 = dma.done.wait (!%p1186_p4), %s966_s16, 256  }
 0x3d0   : > { %1514 = vsyncadd (!%p1186_p4), %s966_s16, 4294967040  ;;  %s28_s26 = sadd.s32 1, %s1537_s26   ;;  %s2064_s21 = smov %s1521_s22 }
 0x3d1   : > { %p25_p6 = scmp.ge.s32.totalorder %s28_s26, 4   ;;  %s2065_s22 = smov %s1525_s23 }
 0x3d2   : > { %s2066_s23 = smov %s1770_s17  ;;  %s2067_s24 = smov %s1533_s25 }
 0x3d3   : > { %s2068_s25 = smov %s2070_s13  ;;  %27 = sbr.rel (!%p25_p6) target bundleno = 12 (0xc), region = 120 }
 0x3da   :  { %971 = vsyncpa [#allocation3], 1 }
 0x3db   :  { %973 = vsyncpa [#allocation3 + $0x1], 1 }
 0x3dc   :  { %974 = vsyncpa [#allocation6], 1 }
 0x3dd   :  { %975 = vsyncpa [#allocation9], 1 }
 0x3de   :  { %976 = vsyncpa [#allocation4], 1 }
 0x3df   :  { %978 = vsyncpa [#allocation4 + $0x1], 1 }
 0x3e0   :  { %979 = vsyncpa [#allocation13], 1 }
 0x3e1   :  { %981 = vsyncpa [#allocation13 + $0x1], 1 }

</bundles_post_ra>
